<compile_context>
chip_gen: v7x
topology: tpu7x:2x2x1
jax: 0.10.0
libtpu: 0.0.40
codegen_flags: <defaults>
</compile_context>

<pallas_src>
import functools

import jax
import jax.numpy as jnp
from jax.experimental import pallas as pl
from jax.experimental.pallas import tpu as pltpu

LOSS_BOOSTING_COEFF = 10000.0
_LANE = 128


def _round_up(x, m):
    return ((x + m - 1) // m) * m


def _cdiv(a, b):
    return -(-a // b)


def _vmem_capacity_bytes():
    """Best-effort per-core VMEM capacity; falls back to the v7x floor."""
    try:
        cap = getattr(pltpu.get_tpu_info(), "vmem_capacity_bytes", None)
        if cap:
            return int(cap)
    except Exception:
        pass
    return 64 << 20          # v7x per-core VMEM: safe lower bound everywhere


def _detect_tensorcores():
    """Best-effort TensorCore count (v7x: 2/chip, v5e/v6e: 1)."""
    try:
        info = pltpu.get_tpu_info()
        for attr in ("num_cores", "core_count", "num_tensorcores"):
            v = getattr(info, attr, None)
            if v:
                return max(1, int(v))
    except Exception:
        pass
    try:
        dev = jax.devices()[0]
        kind = str(getattr(dev, "device_kind", "")).lower()
        if "v7" in kind or "7x" in kind:
            return 2
        nc = getattr(dev, "num_cores", None)
        if nc:
            return max(1, int(nc))
    except Exception:
        pass
    return 1


def _npi_partial_kernel(pred_ref, true_ref, wt_ref,
                        outg_ref, outc_ref, outs_ref,
                        gen_acc, cnt_acc, sse_acc, *, n_chunk):
    """Grid (n_split, tiles_per_core): parallel D-split x serial D-reduction.

    Per step: walk the (b, tile_d) tile in 128-lane chunks with pure VALU
    multiply-adds into three live (b, 128) vregs, then a single += into the
    narrow VMEM accumulators.  Cross-lane reduces only run in the epilogue.
    """
    k = pl.program_id(1)
    nk = pl.num_programs(1)
    b = gen_acc.shape[0]

    @pl.when(k == 0)
    def _init():
        gen_acc[...] = jnp.zeros_like(gen_acc)
        cnt_acc[...] = jnp.zeros_like(cnt_acc)
        sse_acc[...] = jnp.zeros_like(sse_acc)

    sg = sc = ss = None
    for c in range(n_chunk):                      # static unroll (n_chunk <= 64)
        cols = pl.ds(c * _LANE, _LANE)
        p = pred_ref[:, cols].astype(jnp.float32)              # (b, 128)
        t = true_ref[:, cols].astype(jnp.float32)              # (b, 128)
        w0 = wt_ref[0:1, cols]                                  # (1, 128) gen head
        w1 = wt_ref[1:2, cols]                                  # (1, 128) content head
        d = p - t
        if sg is None:
            sg, sc, ss = p * w0, p * w1, d * d
        else:
            sg = sg + p * w0
            sc = sc + p * w1
            ss = ss + d * d

    gen_acc[...] += sg
    cnt_acc[...] += sc
    sse_acc[...] += ss

    @pl.when(k == nk - 1)
    def _finalize():
        # one lane reduce per accumulator; write this core's partials
        outg_ref[...] = jnp.sum(gen_acc[...], axis=-1, keepdims=True)[None]
        outc_ref[...] = jnp.sum(cnt_acc[...], axis=-1, keepdims=True)[None]
        outs_ref[...] = jnp.sum(sse_acc[...], axis=-1, keepdims=True)[None]


def npi_loss_pallas(predicted_activs, true_activs, target_label, w, bias, *,
                    gamma, alpha, beta, max_tile_d=8192, num_cores=None):
    n, m, one, b = predicted_activs.shape
    assert one == 1
    D = n * m

    # keep bf16 activations in bf16 across the pallas_call; otherwise f32
    in_is_bf16 = predicted_activs.dtype == jnp.bfloat16
    io_dtype = jnp.bfloat16 if in_is_bf16 else jnp.float32
    io_bytes = jnp.dtype(io_dtype).itemsize
    rows_vmem = _round_up(b, 16 if in_is_bf16 else 8)   # VMEM sublane padding only

    # --- tiling plan: VMEM-budget derived, multi-step for DMA/compute overlap
    d_lane = _round_up(D, _LANE)
    cap = _vmem_capacity_bytes()
    budget = cap // 2                                    # stay <= ~50% of VMEM
    per_col = 2 * 2 * rows_vmem * io_bytes + 2 * 8 * 4   # dbl-buffered bytes/column
    fit_tile = max(_LANE, (budget // per_col) // _LANE * _LANE)
    tile_cap = max(_LANE, min(_round_up(max_tile_d, _LANE), fit_tile))
    num_tiles = _cdiv(d_lane, tile_cap)

    if num_cores is None:
        num_cores = _detect_tensorcores()
    num_cores = max(1, min(int(num_cores), 8))
    # 2-core split only when every core still gets >= 2 reduction steps
    n_split = num_cores if (num_cores >= 2 and num_tiles >= 2 * num_cores) else 1
    num_tiles = _round_up(num_tiles, n_split)
    tiles_per_core = num_tiles // n_split
    tile_d = _round_up(_cdiv(d_lane, num_tiles), _LANE)
    D_pad = num_tiles * tile_d
    n_chunk = tile_d // _LANE

    # --- host-side layout: (n, m, 1, b) -> lane-dense (b, D_pad); no batch pad.
    # The feature zero-pad fuses into the same pass that materializes the
    # transpose (pred/true padded identically -> 0 SSE, 0 logit contribution).
    def to_2d(x):
        x2 = jnp.transpose(x.reshape(D, b)).astype(io_dtype)   # (b, D)
        if D_pad != D:
            x2 = jnp.pad(x2, ((0, 0), (0, D_pad - D)))
        return x2

    pred2d = to_2d(predicted_activs)
    true2d = to_2d(true_activs)

    # lane-dense classifier weights: (2, D_pad), zero-padded columns beyond D
    wt = jnp.transpose(w.astype(jnp.float32))
    if D_pad != D:
        wt = jnp.pad(wt, ((0, 0), (0, D_pad - D)))

    # VMEM: pred/true double-buffered (io dtype), weights double-buffered
    # (2 rows -> 8 sublanes, f32), three narrow f32 accumulators, tiny outputs.
    vmem_est = (2 * 2 * rows_vmem * tile_d * io_bytes
                + 2 * 8 * tile_d * 4
                + 3 * _round_up(b, 8) * _LANE * 4
                + 6 * _round_up(b, 8) * _LANE * 4)
    vmem_limit = int(min(cap, max(vmem_est + (8 << 20), 32 << 20)))

    act_map = lambda c, k: (0, c * tiles_per_core + k)
    out_map = lambda c, k: (c, 0, 0)
    part_shape = jax.ShapeDtypeStruct((n_split, b, 1), jnp.float32)

    out_g, out_c, out_s = pl.pallas_call(
        functools.partial(_npi_partial_kernel, n_chunk=n_chunk),
        out_shape=(part_shape, part_shape, part_shape),
        grid_spec=pltpu.PrefetchScalarGridSpec(
            num_scalar_prefetch=0,
            grid=(n_split, tiles_per_core),
            in_specs=[
                pl.BlockSpec((b, tile_d), act_map),     # predicted activations
                pl.BlockSpec((b, tile_d), act_map),     # true activations
                pl.BlockSpec((2, tile_d), act_map),     # classifier weights
            ],
            out_specs=(
                pl.BlockSpec((1, b, 1), out_map),       # generation-head partial logits
                pl.BlockSpec((1, b, 1), out_map),       # content-head partial logits
                pl.BlockSpec((1, b, 1), out_map),       # partial SSE (per batch row)
            ),
            scratch_shapes=[
                pltpu.VMEM((b, _LANE), jnp.float32),    # generation-head lane partials
                pltpu.VMEM((b, _LANE), jnp.float32),    # content-head lane partials
                pltpu.VMEM((b, _LANE), jnp.float32),    # SSE lane partials
            ],
        ),
        compiler_params=pltpu.CompilerParams(
            dimension_semantics=("parallel", "arbitrary"),
            vmem_limit_bytes=vmem_limit),
    )(pred2d, true2d, wt)

    # --- trivial epilogue on (b,) partials: combine cores, sigmoid/BCE/MSE mix
    logit_g = jnp.sum(out_g, axis=(0, 2))                       # (b,)
    logit_c = jnp.sum(out_c, axis=(0, 2))                       # (b,)
    sse = jnp.sum(out_s)                                        # scalar
    logits = (jnp.stack([logit_g, logit_c], axis=-1)
              + bias.reshape(1, 2).astype(jnp.float32))         # (b, 2)
    tgt = target_label[:, 0, :, 0].astype(jnp.float32)          # (b, 2)

    # torch.nn.BCELoss semantics (sigmoid probs, log clamped at -100, batch
    # mean); log-sigmoid form for f32 fidelity.
    log_p = jnp.maximum(jax.nn.log_sigmoid(logits), -100.0)
    log_1mp = jnp.maximum(jax.nn.log_sigmoid(-logits), -100.0)
    bce = -(tgt * log_p + (1.0 - tgt) * log_1mp)                # (b, 2)

    new_discrim_score = gamma * jnp.mean(bce[:, 0])
    new_style_score = alpha * jnp.mean(bce[:, 1])
    old_content_score = beta * (sse / float(n * m * 1 * b))
    return LOSS_BOOSTING_COEFF * (new_discrim_score + new_style_score
                                  + old_content_score)


def npi_loss_reference(predicted_activs, true_activs, target_label, w, bias, *,
                       gamma, alpha, beta):
    """Pure-JAX reference mirroring the PyTorch forward (float32)."""
    n, m, _, b = predicted_activs.shape
    D = n * m
    p2 = jnp.transpose(predicted_activs.reshape(D, b)).astype(jnp.float32)
    logits = p2 @ w.astype(jnp.float32) + bias.reshape(1, 2).astype(jnp.float32)
    probs = jax.nn.sigmoid(logits)                  # classifier_labels[:, :, 0/1, :]
    tgt = target_label[:, 0, :, 0].astype(jnp.float32)
    log_p = jnp.maximum(jnp.log(probs), -100.0)
    log_1mp = jnp.maximum(jnp.log(1.0 - probs), -100.0)
    bce = -(tgt * log_p + (1.0 - tgt) * log_1mp)
    new_discrim_score = gamma * jnp.mean(bce[:, 0])
    new_style_score = alpha * jnp.mean(bce[:, 1])
    diff = predicted_activs.astype(jnp.float32) - true_activs.astype(jnp.float32)
    old_content_score = beta * jnp.mean(diff ** 2)
    return LOSS_BOOSTING_COEFF * (new_discrim_score + new_style_score
                                  + old_content_score)


if __name__ == "__main__":
    key = jax.random.PRNGKey(0)
    n, m, b = 8, 32, 4            # predicted/true activs: (n, m, 1, b)
    D = n * m
    k1, k2, k3, k4, k5 = jax.random.split(key, 5)

    predicted_activs = jax.random.normal(k1, (n, m, 1, b), dtype=jnp.float32)
    true_activs = predicted_activs + 0.1 * jax.random.normal(
        k2, (n, m, 1, b), dtype=jnp.float32)
    # target_label: (b, 1, 2, 1); [:, :, 0, :] discrim target, [:, :, 1, :] style target
    target_label = (jax.random.uniform(k3, (b, 1, 2, 1)) > 0.5).astype(jnp.float32)

    # deterministic synthetic classifier heads (generation col 0, content col 1)
    w = 0.05 * jax.random.normal(k4, (D, 2), dtype=jnp.float32)
    bias = 0.01 * jax.random.normal(k5, (2,), dtype=jnp.float32)

    discrim_coeff, style_coeff, similarity_coeff = 0.3, 0.3, 0.4

    loss_fn = jax.jit(functools.partial(
        npi_loss_pallas, gamma=discrim_coeff, alpha=style_coeff,
        beta=similarity_coeff))
    loss = jax.block_until_ready(
        loss_fn(predicted_activs, true_activs, target_label, w, bias))

    ref = npi_loss_reference(predicted_activs, true_activs, target_label, w,
                             bias, gamma=discrim_coeff, alpha=style_coeff,
                             beta=similarity_coeff)
    assert jnp.isfinite(loss), loss
    assert jnp.allclose(loss, ref, rtol=2e-3, atol=1.0), (loss, ref)
    print("KERNEL_OK")
</pallas_src>

<mosaic_0001>
module attributes {stable_mosaic.version = 11 : i64} {
  func.func @_npi_partial_kernel(%arg0: i32, %arg1: i32, %arg2: memref<4x256xf32, #tpu.memory_space<vmem>>, %arg3: memref<4x256xf32, #tpu.memory_space<vmem>>, %arg4: memref<2x256xf32, #tpu.memory_space<vmem>>, %arg5: memref<1x4x1xf32, #tpu.memory_space<vmem>>, %arg6: memref<1x4x1xf32, #tpu.memory_space<vmem>>, %arg7: memref<1x4x1xf32, #tpu.memory_space<vmem>>, %arg8: memref<4x128xf32, #tpu.memory_space<vmem>>, %arg9: memref<4x128xf32, #tpu.memory_space<vmem>>, %arg10: memref<4x128xf32, #tpu.memory_space<vmem>>) attributes {dimension_semantics = [#tpu.dimension_semantics<parallel>, #tpu.dimension_semantics<arbitrary>], iteration_bounds = array<i64: 1, 1>, scalar_prefetch = 0 : i64, scratch_operands = 3 : i64, tpu.core_type = #tpu.core_type<tc>, window_params = [{transform_indices = @transform_0, window_bounds = array<i64: 4, 256>}, {transform_indices = @transform_1, window_bounds = array<i64: 4, 256>}, {transform_indices = @transform_2, window_bounds = array<i64: 2, 256>}, {transform_indices = @transform_3, window_bounds = array<i64: 1, 4, 1>}, {transform_indices = @transform_4, window_bounds = array<i64: 1, 4, 1>}, {transform_indices = @transform_5, window_bounds = array<i64: 1, 4, 1>}]} {
    %c0_i32 = arith.constant 0 : i32
    %0 = arith.cmpi eq, %arg1, %c0_i32 : i32
    %1 = arith.extui %0 : i1 to i32
    %c0_i32_0 = arith.constant 0 : i32
    %2 = arith.cmpi ne, %1, %c0_i32_0 : i32
    scf.if %2 {
      %cst = arith.constant 0.000000e+00 : f32
      %38 = vector.broadcast %cst : f32 to vector<4x128xf32>
      %c0_28 = arith.constant 0 : index
      %c0_29 = arith.constant 0 : index
      %39 = vector.load %arg8[%c0_28, %c0_29] : memref<4x128xf32, #tpu.memory_space<vmem>>, vector<4x128xf32>
      tpu.vector_store %arg8[%c0_28, %c0_29], %38 {strides = array<i32>} : memref<4x128xf32, #tpu.memory_space<vmem>>, vector<4x128xf32>,
      %cst_30 = arith.constant 0.000000e+00 : f32
      %40 = vector.broadcast %cst_30 : f32 to vector<4x128xf32>
      %c0_31 = arith.constant 0 : index
      %c0_32 = arith.constant 0 : index
      %41 = vector.load %arg9[%c0_31, %c0_32] : memref<4x128xf32, #tpu.memory_space<vmem>>, vector<4x128xf32>
      tpu.vector_store %arg9[%c0_31, %c0_32], %40 {strides = array<i32>} : memref<4x128xf32, #tpu.memory_space<vmem>>, vector<4x128xf32>,
      %cst_33 = arith.constant 0.000000e+00 : f32
      %42 = vector.broadcast %cst_33 : f32 to vector<4x128xf32>
      %c0_34 = arith.constant 0 : index
      %c0_35 = arith.constant 0 : index
      %43 = vector.load %arg10[%c0_34, %c0_35] : memref<4x128xf32, #tpu.memory_space<vmem>>, vector<4x128xf32>
      tpu.vector_store %arg10[%c0_34, %c0_35], %42 {strides = array<i32>} : memref<4x128xf32, #tpu.memory_space<vmem>>, vector<4x128xf32>,
    } else {
    }
    %c0 = arith.constant 0 : index
    %c0_1 = arith.constant 0 : index
    %3 = vector.load %arg2[%c0, %c0_1] : memref<4x256xf32, #tpu.memory_space<vmem>>, vector<4x128xf32>
    %c0_2 = arith.constant 0 : index
    %c0_3 = arith.constant 0 : index
    %4 = vector.load %arg3[%c0_2, %c0_3] : memref<4x256xf32, #tpu.memory_space<vmem>>, vector<4x128xf32>
    %c0_4 = arith.constant 0 : index
    %c0_5 = arith.constant 0 : index
    %5 = vector.load %arg4[%c0_4, %c0_5] : memref<2x256xf32, #tpu.memory_space<vmem>>, vector<1x128xf32>
    %c1 = arith.constant 1 : index
    %c0_6 = arith.constant 0 : index
    %6 = vector.load %arg4[%c1, %c0_6] : memref<2x256xf32, #tpu.memory_space<vmem>>, vector<1x128xf32>
    %7 = arith.subf %3, %4 : vector<4x128xf32>
    %8 = vector.broadcast %5 : vector<1x128xf32> to vector<4x128xf32>
    %9 = arith.mulf %3, %8 : vector<4x128xf32>
    %10 = vector.broadcast %6 : vector<1x128xf32> to vector<4x128xf32>
    %11 = arith.mulf %3, %10 : vector<4x128xf32>
    %12 = arith.mulf %7, %7 : vector<4x128xf32>
    %c0_7 = arith.constant 0 : index
    %c128 = arith.constant 128 : index
    %13 = vector.load %arg2[%c0_7, %c128] : memref<4x256xf32, #tpu.memory_space<vmem>>, vector<4x128xf32>
    %c0_8 = arith.constant 0 : index
    %c128_9 = arith.constant 128 : index
    %14 = vector.load %arg3[%c0_8, %c128_9] : memref<4x256xf32, #tpu.memory_space<vmem>>, vector<4x128xf32>
    %c0_10 = arith.constant 0 : index
    %c128_11 = arith.constant 128 : index
    %15 = vector.load %arg4[%c0_10, %c128_11] : memref<2x256xf32, #tpu.memory_space<vmem>>, vector<1x128xf32>
    %c1_12 = arith.constant 1 : index
    %c128_13 = arith.constant 128 : index
    %16 = vector.load %arg4[%c1_12, %c128_13] : memref<2x256xf32, #tpu.memory_space<vmem>>, vector<1x128xf32>
    %17 = arith.subf %13, %14 : vector<4x128xf32>
    %18 = vector.broadcast %15 : vector<1x128xf32> to vector<4x128xf32>
    %19 = arith.mulf %13, %18 : vector<4x128xf32>
    %20 = arith.addf %9, %19 : vector<4x128xf32>
    %21 = vector.broadcast %16 : vector<1x128xf32> to vector<4x128xf32>
    %22 = arith.mulf %13, %21 : vector<4x128xf32>
    %23 = arith.addf %11, %22 : vector<4x128xf32>
    %24 = arith.mulf %17, %17 : vector<4x128xf32>
    %25 = arith.addf %12, %24 : vector<4x128xf32>
    %c0_14 = arith.constant 0 : index
    %c0_15 = arith.constant 0 : index
    %26 = vector.load %arg8[%c0_14, %c0_15] : memref<4x128xf32, #tpu.memory_space<vmem>>, vector<4x128xf32>
    %27 = arith.addf %26, %20 : vector<4x128xf32>
    %c0_16 = arith.constant 0 : index
    %c0_17 = arith.constant 0 : index
    %28 = vector.load %arg8[%c0_16, %c0_17] : memref<4x128xf32, #tpu.memory_space<vmem>>, vector<4x128xf32>
    tpu.vector_store %arg8[%c0_16, %c0_17], %27 {strides = array<i32>} : memref<4x128xf32, #tpu.memory_space<vmem>>, vector<4x128xf32>,
    %c0_18 = arith.constant 0 : index
    %c0_19 = arith.constant 0 : index
    %29 = vector.load %arg9[%c0_18, %c0_19] : memref<4x128xf32, #tpu.memory_space<vmem>>, vector<4x128xf32>
    %30 = arith.addf %29, %23 : vector<4x128xf32>
    %c0_20 = arith.constant 0 : index
    %c0_21 = arith.constant 0 : index
    %31 = vector.load %arg9[%c0_20, %c0_21] : memref<4x128xf32, #tpu.memory_space<vmem>>, vector<4x128xf32>
    tpu.vector_store %arg9[%c0_20, %c0_21], %30 {strides = array<i32>} : memref<4x128xf32, #tpu.memory_space<vmem>>, vector<4x128xf32>,
    %c0_22 = arith.constant 0 : index
    %c0_23 = arith.constant 0 : index
    %32 = vector.load %arg10[%c0_22, %c0_23] : memref<4x128xf32, #tpu.memory_space<vmem>>, vector<4x128xf32>
    %33 = arith.addf %32, %25 : vector<4x128xf32>
    %c0_24 = arith.constant 0 : index
    %c0_25 = arith.constant 0 : index
    %34 = vector.load %arg10[%c0_24, %c0_25] : memref<4x128xf32, #tpu.memory_space<vmem>>, vector<4x128xf32>
    tpu.vector_store %arg10[%c0_24, %c0_25], %33 {strides = array<i32>} : memref<4x128xf32, #tpu.memory_space<vmem>>, vector<4x128xf32>,
    %c0_i32_26 = arith.constant 0 : i32
    %35 = arith.cmpi eq, %arg1, %c0_i32_26 : i32
    %36 = arith.extui %35 : i1 to i32
    %c0_i32_27 = arith.constant 0 : i32
    %37 = arith.cmpi ne, %36, %c0_i32_27 : i32
    scf.if %37 {
      %c0_28 = arith.constant 0 : index
      %c0_29 = arith.constant 0 : index
      %38 = vector.load %arg8[%c0_28, %c0_29] : memref<4x128xf32, #tpu.memory_space<vmem>>, vector<4x128xf32>
      %cst = arith.constant dense<0.000000e+00> : vector<4xf32>
      %39 = vector.multi_reduction <add>, %38, %cst [1] : vector<4x128xf32> to vector<4xf32>
      %40 = vector.shape_cast %39 : vector<4xf32> to vector<4x1xf32>
      %41 = vector.shape_cast %40 : vector<4x1xf32> to vector<1x4x1xf32>
      %c0_30 = arith.constant 0 : index
      %c0_31 = arith.constant 0 : index
      %c0_32 = arith.constant 0 : index
      %42 = vector.load %arg5[%c0_30, %c0_31, %c0_32] : memref<1x4x1xf32, #tpu.memory_space<vmem>>, vector<1x4x1xf32>
      tpu.vector_store %arg5[%c0_30, %c0_31, %c0_32], %41 {strides = array<i32>} : memref<1x4x1xf32, #tpu.memory_space<vmem>>, vector<1x4x1xf32>,
      %c0_33 = arith.constant 0 : index
      %c0_34 = arith.constant 0 : index
      %43 = vector.load %arg9[%c0_33, %c0_34] : memref<4x128xf32, #tpu.memory_space<vmem>>, vector<4x128xf32>
      %cst_35 = arith.constant dense<0.000000e+00> : vector<4xf32>
      %44 = vector.multi_reduction <add>, %43, %cst_35 [1] : vector<4x128xf32> to vector<4xf32>
      %45 = vector.shape_cast %44 : vector<4xf32> to vector<4x1xf32>
      %46 = vector.shape_cast %45 : vector<4x1xf32> to vector<1x4x1xf32>
      %c0_36 = arith.constant 0 : index
      %c0_37 = arith.constant 0 : index
      %c0_38 = arith.constant 0 : index
      %47 = vector.load %arg6[%c0_36, %c0_37, %c0_38] : memref<1x4x1xf32, #tpu.memory_space<vmem>>, vector<1x4x1xf32>
      tpu.vector_store %arg6[%c0_36, %c0_37, %c0_38], %46 {strides = array<i32>} : memref<1x4x1xf32, #tpu.memory_space<vmem>>, vector<1x4x1xf32>,
      %c0_39 = arith.constant 0 : index
      %c0_40 = arith.constant 0 : index
      %48 = vector.load %arg10[%c0_39, %c0_40] : memref<4x128xf32, #tpu.memory_space<vmem>>, vector<4x128xf32>
      %cst_41 = arith.constant dense<0.000000e+00> : vector<4xf32>
      %49 = vector.multi_reduction <add>, %48, %cst_41 [1] : vector<4x128xf32> to vector<4xf32>
      %50 = vector.shape_cast %49 : vector<4xf32> to vector<4x1xf32>
      %51 = vector.shape_cast %50 : vector<4x1xf32> to vector<1x4x1xf32>
      %c0_42 = arith.constant 0 : index
      %c0_43 = arith.constant 0 : index
      %c0_44 = arith.constant 0 : index
      %52 = vector.load %arg7[%c0_42, %c0_43, %c0_44] : memref<1x4x1xf32, #tpu.memory_space<vmem>>, vector<1x4x1xf32>
      tpu.vector_store %arg7[%c0_42, %c0_43, %c0_44], %51 {strides = array<i32>} : memref<1x4x1xf32, #tpu.memory_space<vmem>>, vector<1x4x1xf32>,
    } else {
    }
    return
  }
  func.func @transform_0(%arg0: i32, %arg1: i32) -> (i32, i32) {
    %c1_i32 = arith.constant 1 : i32
    %0 = arith.muli %arg0, %c1_i32 : i32
    %1 = arith.addi %0, %arg1 : i32
    %c0_i32 = arith.constant 0 : i32
    %c0_i32_0 = arith.constant 0 : i32
    return %c0_i32, %1 : i32, i32
  }
  func.func @transform_1(%arg0: i32, %arg1: i32) -> (i32, i32) {
    %c1_i32 = arith.constant 1 : i32
    %0 = arith.muli %arg0, %c1_i32 : i32
    %1 = arith.addi %0, %arg1 : i32
    %c0_i32 = arith.constant 0 : i32
    %c0_i32_0 = arith.constant 0 : i32
    return %c0_i32, %1 : i32, i32
  }
  func.func @transform_2(%arg0: i32, %arg1: i32) -> (i32, i32) {
    %c1_i32 = arith.constant 1 : i32
    %0 = arith.muli %arg0, %c1_i32 : i32
    %1 = arith.addi %0, %arg1 : i32
    %c0_i32 = arith.constant 0 : i32
    %c0_i32_0 = arith.constant 0 : i32
    return %c0_i32, %1 : i32, i32
  }
  func.func @transform_3(%arg0: i32, %arg1: i32) -> (i32, i32, i32) {
    %c0_i32 = arith.constant 0 : i32
    %c0_i32_0 = arith.constant 0 : i32
    %c0_i32_1 = arith.constant 0 : i32
    return %arg0, %c0_i32, %c0_i32_0 : i32, i32, i32
  }
  func.func @transform_4(%arg0: i32, %arg1: i32) -> (i32, i32, i32) {
    %c0_i32 = arith.constant 0 : i32
    %c0_i32_0 = arith.constant 0 : i32
    %c0_i32_1 = arith.constant 0 : i32
    return %arg0, %c0_i32, %c0_i32_0 : i32, i32, i32
  }
  func.func @transform_5(%arg0: i32, %arg1: i32) -> (i32, i32, i32) {
    %c0_i32 = arith.constant 0 : i32
    %c0_i32_0 = arith.constant 0 : i32
    %c0_i32_1 = arith.constant 0 : i32
    return %arg0, %c0_i32, %c0_i32_0 : i32, i32, i32
  }
}

</mosaic_0001>

<bundles_post_ra>
// kernel: npi_loss_pallas.1
= control target key start
LH: loop header
LB: loop body
LE: loop exit
PB: predicated region body
PF: predicated region fallthrough
CT: control target
= control target key end

     0   :  { %v189_v0 = vmov 0.0   ;;  %vm138_vm0 = vcmask 1043456   ;;  %vm142_vm1 = vcmask 3072   ;;  %s253_s0 = inlined_call_operand.vmem [shape: f32[4,256], index: 0, kind: input, shape index: {}]   ;;  %s254_s2 = inlined_call_operand.vmem [shape: f32[2,256], index: 2, kind: input, shape index: {}]   ;;  %s255_s1 = inlined_call_operand.vmem [shape: f32[4,256], index: 1, kind: input, shape index: {}]   ;;  %s256_s3 = inlined_call_operand.vmem [shape: f32[1,4,1], index: 3, kind: output, shape index: {0}]   ;;  %s257_s5 = inlined_call_operand.vmem [shape: f32[1,4,1], index: 5, kind: output, shape index: {2}]   ;;  %s258_s4 = inlined_call_operand.vmem [shape: f32[1,4,1], index: 4, kind: output, shape index: {1}]  }
   0x1   :  { %87 = vst [vmem:[#allocation2] sm:$0xf] %v189_v0  ;;  %v90_v1 = vld [vmem:[%s253_s0] sm:$0xf]  ;;  %v106_v3 = vld [vmem:[%s253_s0 + $0x4] sm:$0xf] }
   0x2   :  { %v184_v2 = vld [vmem:[%s254_s2] ss:$0 sm:$0xff]  ;;  %88 = vst [vmem:[#allocation3] sm:$0xf] %v189_v0  ;;  %89 = vst [vmem:[#allocation4] sm:$0xf] %v189_v0 }
   0x3   :  { %v99_v4 = vmul.f32 %v184_v2, %v90_v1  ;;  %v186_v5 = vld [vmem:[%s254_s2 + $0x2] ss:$0 sm:$0xff]  ;;  %v185_v6 = vld [vmem:[%s254_s2 + $0x1] ss:$0 sm:$0xff]  ;;  %v187_v7 = vld [vmem:[%s254_s2 + $0x3] ss:$0 sm:$0xff] }
   0x4   :  { %v115_v8 = vmul.f32 %v186_v5, %v106_v3  ;;  %v104_v9 = vmul.f32 %v185_v6, %v90_v1  ;;  %v121_v10 = vmul.f32 %v187_v7, %v106_v3  ;;  %v91_v11 = vld [vmem:[%s255_s1] sm:$0xf]  ;;  %v107_v12 = vld [vmem:[%s255_s1 + $0x4] sm:$0xf] }
   0x5   :  { %v94_v13 = vsub.f32 %v90_v1, %v91_v11  ;;  %v110_v14 = vsub.f32 %v106_v3, %v107_v12 }
   0x6   :  { %v116_v15 = vadd.f32 %v115_v8, %v99_v4  ;;  %v122_v16 = vadd.f32 %v121_v10, %v104_v9 }
   0x7   :  { %v105_v17 = vmul.f32 %v94_v13, %v94_v13  ;;  %v123_v18 = vmul.f32 %v110_v14, %v110_v14 }
   0x8   :  { %v125_v19 = vld [vmem:[#allocation2] sm:$0xf] }
   0x9   :  { %v128_v20 = vld [vmem:[#allocation3] sm:$0xf]  ;;  %v124_v21 = vadd.f32 %v123_v18, %v105_v17  ;;  %v131_v22 = vld [vmem:[#allocation4] sm:$0xf]  ;;  %v126_v23 = vadd.f32 %v125_v19, %v116_v15 }
   0xa   :  { %v129_v24 = vadd.f32 %v128_v20, %v122_v16 }
   0xb   :  { %v132_v25 = vadd.f32 %v131_v22, %v124_v21  ;;  %127 = vst [vmem:[#allocation2] sm:$0xf] %v126_v23 }
   0xc   :  { %130 = vst [vmem:[#allocation3] sm:$0xf] %v129_v24 }
   0xd   :  { %133 = vst [vmem:[#allocation4] sm:$0xf] %v132_v25 }
  0x12   :  { %v137_v26 = vld [vmem:[#allocation2] sm:$0xf] }
  0x13   :  { %v144_v27 = vld [vmem:[#allocation3] sm:$0xf]  ;;  %v139_v28 = vsel %vm138_vm0, %v137_v26, 0.0 }
  0x14   :  { %v149_v29 = vld [vmem:[#allocation4] sm:$0xf]  ;;  %140 = vadd.xlane.f32.xlu0 %v139_v28  ;;  %v145_v31 = vsel %vm138_vm0, %v144_v27, 0.0 }
  0x15   :  { %v150_v30 = vsel %vm138_vm0, %v149_v29, 0.0 }
  0x16   :  { %151 = vadd.xlane.f32.xlu1 %v150_v30 }
  0x18   :  { %146 = vadd.xlane.f32.xlu0 %v145_v31 }
  0xa1   :  { %v141_v32 = vpop.xlane.xlu0 %140 }
  0xa2   :  { %143 = vst.msk [vmem:[%s256_s3] sm:$0xf] %vm142_vm1, %v141_v32 }
  0xa3   :  { %v152_v33 = vpop.xlane.xlu1 %151 }
  0xa4   :  { %153 = vst.msk [vmem:[%s257_s5] sm:$0xf] %vm142_vm1, %v152_v33 }
  0xa5   :  { %v147_v34 = vpop.xlane.xlu0 %146 }
  0xa6   :  { %148 = vst.msk [vmem:[%s258_s4] sm:$0xf] %vm142_vm1, %v147_v34 }

</bundles_post_ra>
